<compile_context>
chip_gen: v7x
topology: tpu7x:2x2x1
jax: 0.10.0
libtpu: 0.0.40
codegen_flags: <defaults>
</compile_context>

<pallas_src>
import numpy as np
import jax
import jax.numpy as jnp
from jax.experimental import pallas as pl
from jax.experimental.pallas import tpu as pltpu


def _round_up(x, m):
    return (x + m - 1) // m * m


# ----------------------------- Pallas kernel --------------------------------


def _make_generator_kernel(n_mid: int, s_blk: int, bp: int, lane: int,
                           o_bias: int, nb_pad: int):
    """Vector-field kernel for one block of S_BLK solver steps.

    n_mid  : number of HH->HH middle layers in f_net (= num_layers - 1)
    s_blk  : steps per grid iteration
    bp     : padded batch (multiple of 8)
    lane   : padded feature width (multiple of 128)
    o_bias : row offset of the bias region inside the weight slab
    nb_pad : number of (padded) bias rows
    """
    m = s_blk * bp

    def kernel(frac_ref, coeff_ref, y_ref, w_ref, o_ref):
        # --- cubic spline X(t): Horner, vectorized over the whole step block.
        # Coefficients were pre-gathered per step on lanes [H:H+D]; lane H+D
        # holds (times[idx], 1, 0, 0) so the same Horner reconstructs t.
        frac = frac_ref[...]                              # (s_blk, 1, 1) f32
        x = coeff_ref[2] + frac * coeff_ref[3]
        x = coeff_ref[1] + frac * x
        x = coeff_ref[0] + frac * x                       # (s_blk, bp, lane)

        # --- merged first-layer input u = [y | X(t) | t] (disjoint lanes) ----
        u = (y_ref[...] + x).reshape(m, lane).astype(jnp.bfloat16)

        bias = w_ref[o_bias:o_bias + nb_pad, :].astype(jnp.float32)

        def wblk(i):                                      # (lane, lane) bf16
            return w_ref[i * lane:(i + 1) * lane, :]

        # fused (linear_in | linear_X) -> emb -> f_net[0], then ReLU
        h = jnp.dot(u, wblk(0), preferred_element_type=jnp.float32) + bias[0]
        h = jnp.maximum(h, 0.0)

        # middle f_net layers (Linear + ReLU)
        for i in range(n_mid):
            h = jnp.dot(h.astype(jnp.bfloat16), wblk(1 + i),
                        preferred_element_type=jnp.float32) + bias[1 + i]
            h = jnp.maximum(h, 0.0)

        # fused f_net[last] -> linear_out
        h = jnp.dot(h.astype(jnp.bfloat16), wblk(1 + n_mid),
                    preferred_element_type=jnp.float32) + bias[1 + n_mid]

        o_ref[...] = h.reshape(s_blk, bp, lane)

    return kernel


# --------------------------- Host-side preparation ---------------------------


def prepare_fused_params(params, input_dim, hidden_dim, hidden_hidden_dim):
    """Compose back-to-back Linears (float64) and pack one bf16 weight slab.

    Slab layout (lane = round_up(max(H, HH, H+D+1), 128), all cols padded):
      block 0          : merged first layer  rows[0:H]=A_y, [H:H+D]=A_x,
                         row H+D = a_t   (so u = [y | X(t) | t] -> one matmul)
      block 1..n_mid   : f_net middle weights (HH x HH)
      block 1+n_mid    : W_fin = W_f_last @ W_out         (HH x H)
      bias region      : row 0 = b0 (first fused layer), rows 1..n_mid = mid
                         biases, row 1+n_mid = b_fin; padded to 16 rows.
    """
    H, HH, D = hidden_dim, hidden_hidden_dim, input_dim
    lane = _round_up(max(H, HH, H + D + 1), 128)

    def f64(x):
        return np.asarray(x, dtype=np.float64)

    f_net = params["f_net"]
    f_w0, f_b0 = f_net[0]
    mids = f_net[1:-1]
    f_wl, f_bl = f_net[-1]

    emb_y_f0 = f64(params["w_emb_y"]) @ f64(f_w0)          # (H, HH)
    emb_x_f0 = f64(params["w_emb_x"]) @ f64(f_w0)          # (H, HH)

    A_y = f64(params["w_in_y"]) @ emb_y_f0                 # (H, HH)
    A_x = f64(params["wX"]) @ emb_x_f0                     # (D, HH)
    a_t = f64(params["w_in_t"]) @ emb_y_f0                 # (1, HH)
    b0 = (f64(params["b_in"]) @ emb_y_f0
          + f64(params["bX"]) @ emb_x_f0
          + f64(params["b_emb"]) @ f64(f_w0)
          + f64(f_b0))                                     # (1, HH)

    W_fin = f64(f_wl) @ f64(params["w_out"])               # (HH, H)
    b_fin = f64(f_bl) @ f64(params["w_out"]) + f64(params["b_out"])  # (1, H)

    n_mid = len(mids)
    n_blocks = n_mid + 2                     # merged-in, mids..., final
    n_bias = n_mid + 2
    nb_pad = _round_up(n_bias, 16)           # bf16 sublane-tile alignment
    o_bias = n_blocks * lane

    slab = np.zeros((o_bias + nb_pad, lane), dtype=np.float64)

    # merged first-layer block
    slab[0:H, :HH] = A_y
    slab[H:H + D, :HH] = A_x
    slab[H + D:H + D + 1, :HH] = a_t
    # middle layers
    for i, (w, _) in enumerate(mids):
        off = (1 + i) * lane
        slab[off:off + HH, :HH] = f64(w)
    # fused final layer
    off = (1 + n_mid) * lane
    slab[off:off + HH, :H] = W_fin
    # biases
    slab[o_bias, :HH] = b0[0]
    for i, (_, b) in enumerate(mids):
        slab[o_bias + 1 + i, :HH] = f64(b)[0]
    slab[o_bias + 1 + n_mid, :H] = b_fin[0]

    slab_bf16 = jnp.asarray(slab.astype(np.float32), dtype=jnp.bfloat16)
    return dict(slab=slab_bf16, lane=lane, n_mid=n_mid, o_bias=o_bias,
                nb_pad=nb_pad, hidden_dim=H, input_dim=D)


# ------------------------------ Host wrapper ---------------------------------


def generator_func_forward_steps(t_steps, y_steps, spline_coeffs, spline_times,
                                 fused, *, target_rows=128):
    """Evaluate the GeneratorFunc vector field at S independent (t, y) points.

    One gridded pallas_call; each grid iteration processes S_BLK steps so that
    every matmul has M = S_BLK * B rows (128 here).  target_rows: 128 is the
    v5e-natural tile; set 256 on v6e/v7x when S*B is large enough (while still
    keeping >= 2 grid iterations for the two v7x TensorCores).
    """
    S, B, H = y_steps.shape
    lane = fused["lane"]
    D = fused["input_dim"]
    slab = fused["slab"]
    n_int = spline_times.shape[0] - 1

    # --- batching geometry ----------------------------------------------------
    bp = _round_up(max(B, 8), 8)                      # sublane-aligned batch
    s_blk = max(1, min(S, target_rows // bp))         # steps per grid iteration
    if S > 1 and (S + s_blk - 1) // s_blk < 2:        # keep >= 2 grid iterations
        s_blk = (S + 1) // 2
    sp = _round_up(S, s_blk)
    grid = sp // s_blk

    # --- pad the step axis (replicate last t, zero-pad y) ----------------------
    if sp > S:
        t_pad = jnp.concatenate(
            [t_steps, jnp.broadcast_to(t_steps[-1:], (sp - S,))], axis=0)
        y_pad = jnp.concatenate(
            [y_steps, jnp.zeros((sp - S, B, H), y_steps.dtype)], axis=0)
    else:
        t_pad, y_pad = t_steps, y_steps
    t_pad = t_pad.astype(jnp.float32)

    # --- spline interval lookup + per-step coefficient pre-gather --------------
    idx = jnp.clip(jnp.searchsorted(spline_times, t_pad, side="right") - 1,
                   0, n_int - 1)
    knot = spline_times[idx].astype(jnp.float32)
    frac = (t_pad - knot).reshape(sp, 1, 1)

    stacked = jnp.stack([spline_coeffs[k] for k in ("a", "b", "c", "d")],
                        axis=0).astype(jnp.float32)        # (4, B, n_int, D)
    g = jnp.take(stacked, idx, axis=2)                     # (4, B, sp, D)
    g = jnp.transpose(g, (0, 2, 1, 3))                     # (4, sp, B, D)
    coeff = jnp.zeros((4, sp, bp, lane), jnp.float32)
    coeff = coeff.at[:, :, :B, H:H + D].set(g)             # X(t) on lanes [H:H+D]
    coeff = coeff.at[0, :, :B, H + D].set(knot[:, None])   # lane H+D: knot+frac*1
    coeff = coeff.at[1, :, :B, H + D].set(1.0)             #   == t exactly

    # --- y on lanes [0:H] -------------------------------------------------------
    y_in = jnp.zeros((sp, bp, lane), jnp.float32)
    y_in = y_in.at[:, :B, :H].set(y_pad.astype(jnp.float32))

    kernel = _make_generator_kernel(fused["n_mid"], s_blk, bp, lane,
                                    fused["o_bias"], fused["nb_pad"])

    grid_spec = pltpu.PrefetchScalarGridSpec(
        num_scalar_prefetch=0,
        grid=(grid,),
        in_specs=[
            # per-step frac for the in-kernel Horner (tiny, blocked by step)
            pl.BlockSpec((s_blk, 1, 1), lambda i: (i, 0, 0)),
            # pre-gathered spline coefficients, blocked by step
            pl.BlockSpec((4, s_blk, bp, lane), lambda i: (0, i, 0, 0)),
            # state y, blocked by step
            pl.BlockSpec((s_blk, bp, lane), lambda i: (i, 0, 0)),
            # fused bf16 weight slab: constant index_map -> resident in VMEM
            pl.BlockSpec(slab.shape, lambda i: (0, 0)),
        ],
        out_specs=pl.BlockSpec((s_blk, bp, lane), lambda i: (i, 0, 0)),
    )

    out_pad = pl.pallas_call(
        kernel,
        out_shape=jax.ShapeDtypeStruct((sp, bp, lane), jnp.float32),
        grid_spec=grid_spec,
        compiler_params=pltpu.CompilerParams(
            dimension_semantics=("parallel",)),
    )(frac, coeff, y_in, slab)

    return out_pad[:S, :B, :H]


# --------------------------- Parameter construction --------------------------


def init_params(key, input_dim, hidden_dim, hidden_hidden_dim, num_layers):
    """Deterministic synthetic parameters, shapes match the PyTorch module
    (Linear weights stored pre-transposed as [in, out], biases as [1, out])."""
    ks = iter(jax.random.split(key, 32))

    def lin(kw, kb, fan_in, fan_out):
        bound = 1.0 / jnp.sqrt(fan_in)
        w = jax.random.uniform(kw, (fan_in, fan_out), jnp.float32, -bound, bound)
        b = jax.random.uniform(kb, (1, fan_out), jnp.float32, -bound, bound)
        return w, b

    # linear_in : (hidden_dim + 1) -> hidden_dim ; split into t-row and y-rows
    w_in_full, b_in = lin(next(ks), next(ks), hidden_dim + 1, hidden_dim)
    w_in_t = w_in_full[0:1, :]
    w_in_y = w_in_full[1:, :]

    # linear_X : input_dim -> hidden_dim
    wX, bX = lin(next(ks), next(ks), input_dim, hidden_dim)

    # emb : 2*hidden_dim -> hidden_dim ; split into yy-block and Xt-block
    w_emb_full, b_emb = lin(next(ks), next(ks), 2 * hidden_dim, hidden_dim)
    w_emb_y = w_emb_full[:hidden_dim, :]
    w_emb_x = w_emb_full[hidden_dim:, :]

    # f_net : MLP(hidden_dim, hidden_dim, hidden_hidden_dim, num_layers)
    f_net = [lin(next(ks), next(ks), hidden_dim, hidden_hidden_dim)]
    for _ in range(num_layers - 1):
        f_net.append(lin(next(ks), next(ks), hidden_hidden_dim, hidden_hidden_dim))
    f_net.append(lin(next(ks), next(ks), hidden_hidden_dim, hidden_dim))

    # linear_out : hidden_dim -> hidden_dim
    w_out, b_out = lin(next(ks), next(ks), hidden_dim, hidden_dim)

    return dict(wX=wX, bX=bX, w_in_y=w_in_y, w_in_t=w_in_t, b_in=b_in,
                w_emb_y=w_emb_y, w_emb_x=w_emb_x, b_emb=b_emb,
                f_net=f_net, w_out=w_out, b_out=b_out)


# ------------------------------ Pure-JAX reference ----------------------------


def reference_forward(t, y, spline_coeffs, spline_times, params):
    """Unfused per-layer f32 reference (mirrors the PyTorch forward exactly)."""
    times = spline_times
    idx = jnp.clip(jnp.searchsorted(times, t, side="right") - 1,
                   0, times.shape[0] - 2)
    frac = t - times[idx]
    xt_raw = (spline_coeffs["a"][:, idx] + frac * (spline_coeffs["b"][:, idx]
              + frac * (spline_coeffs["c"][:, idx]
              + frac * spline_coeffs["d"][:, idx])))
    xt = xt_raw @ params["wX"] + params["bX"]
    t_col = jnp.full((y.shape[0], 1), t, dtype=jnp.float32)
    yy = y @ params["w_in_y"] + t_col * params["w_in_t"] + params["b_in"]
    z = yy @ params["w_emb_y"] + xt @ params["w_emb_x"] + params["b_emb"]
    n = len(params["f_net"])
    for i, (w, b) in enumerate(params["f_net"]):
        z = z @ w + b
        if i < n - 1:
            z = jnp.maximum(z, 0.0)
    return z @ params["w_out"] + params["b_out"]


# ----------------------------------- Main -------------------------------------


if __name__ == "__main__":
    batch = 8
    input_dim = 16
    hidden_dim = 32
    hidden_hidden_dim = 64
    num_layers = 2
    n_intervals = 8
    n_steps = 32          # -> S_BLK=16, M=128 per matmul, grid=(2,)

    key = jax.random.PRNGKey(0)
    k_par, k_y, k_t, k_a, k_b, k_c, k_d = jax.random.split(key, 7)

    params = init_params(k_par, input_dim, hidden_dim, hidden_hidden_dim,
                         num_layers)

    # S independent (t, y) evaluation points of the vector field
    y_steps = jax.random.normal(k_y, (n_steps, batch, hidden_dim), jnp.float32)
    t_steps = jnp.sort(jax.random.uniform(k_t, (n_steps,), jnp.float32, 0.0, 1.0))

    # TODO(synk): torchcde.natural_cubic_coeffs (coefficient *construction*) is
    # not reproduced; per-interval cubic coefficients (a,b,c,d) are taken as
    # given, which is exactly what CubicSpline.evaluate consumes.
    spline_coeffs = {
        "a": jax.random.normal(k_a, (batch, n_intervals, input_dim), jnp.float32),
        "b": jax.random.normal(k_b, (batch, n_intervals, input_dim), jnp.float32),
        "c": jax.random.normal(k_c, (batch, n_intervals, input_dim), jnp.float32),
        "d": jax.random.normal(k_d, (batch, n_intervals, input_dim), jnp.float32),
    }
    spline_times = jnp.linspace(0.0, 1.0, n_intervals + 1).astype(jnp.float32)

    # one-time host-side prep: fuse back-to-back Linears, pack the bf16 slab
    fused = prepare_fused_params(params, input_dim, hidden_dim,
                                 hidden_hidden_dim)

    out = generator_func_forward_steps(t_steps, y_steps, spline_coeffs,
                                       spline_times, fused)
    out = jax.block_until_ready(out)

    refs = jnp.stack(
        [reference_forward(t_steps[s], y_steps[s], spline_coeffs, spline_times,
                           params) for s in range(n_steps)], axis=0)

    assert out.shape == (n_steps, batch, hidden_dim)
    max_err = float(jnp.max(jnp.abs(out - refs)))
    # bf16 weights / bf16 MXU operands with f32 accumulation: tolerance widened
    # accordingly (per the review's note on re-validating after adopting bf16).
    assert jnp.allclose(out, refs, atol=2e-2, rtol=2e-2), (
        f"mismatch vs reference, max abs err = {max_err}")

    print("KERNEL_OK")
</pallas_src>

<mosaic_0001>
module attributes {stable_mosaic.version = 11 : i64} {
  func.func @kernel(%arg0: i32, %arg1: memref<16x1x1xf32, #tpu.memory_space<vmem>>, %arg2: memref<4x16x8x128xf32, #tpu.memory_space<vmem>>, %arg3: memref<16x8x128xf32, #tpu.memory_space<vmem>>, %arg4: memref<400x128xbf16, #tpu.memory_space<vmem>>, %arg5: memref<16x8x128xf32, #tpu.memory_space<vmem>>) attributes {dimension_semantics = [#tpu.dimension_semantics<parallel>], iteration_bounds = array<i64: 2>, scalar_prefetch = 0 : i64, scratch_operands = 0 : i64, tpu.core_type = #tpu.core_type<tc>, window_params = [{transform_indices = @transform_0, window_bounds = array<i64: 16, 1, 1>}, {transform_indices = @transform_1, window_bounds = array<i64: 4, 16, 8, 128>}, {transform_indices = @transform_2, window_bounds = array<i64: 16, 8, 128>}, {pipeline_mode = #tpu.pipeline_mode<synchronous>, transform_indices = @transform_3, window_bounds = array<i64: 400, 128>}, {transform_indices = @transform_4, window_bounds = array<i64: 16, 8, 128>}]} {
    %c0 = arith.constant 0 : index
    %c0_0 = arith.constant 0 : index
    %c0_1 = arith.constant 0 : index
    %0 = vector.load %arg1[%c0, %c0_0, %c0_1] : memref<16x1x1xf32, #tpu.memory_space<vmem>>, vector<16x1x1xf32>
    %c2 = arith.constant 2 : index
    %c0_2 = arith.constant 0 : index
    %c0_3 = arith.constant 0 : index
    %c0_4 = arith.constant 0 : index
    %1 = vector.load %arg2[%c2, %c0_2, %c0_3, %c0_4] : memref<4x16x8x128xf32, #tpu.memory_space<vmem>>, vector<1x16x8x128xf32>
    %2 = vector.shape_cast %1 : vector<1x16x8x128xf32> to vector<16x8x128xf32>
    %c3 = arith.constant 3 : index
    %c0_5 = arith.constant 0 : index
    %c0_6 = arith.constant 0 : index
    %c0_7 = arith.constant 0 : index
    %3 = vector.load %arg2[%c3, %c0_5, %c0_6, %c0_7] : memref<4x16x8x128xf32, #tpu.memory_space<vmem>>, vector<1x16x8x128xf32>
    %4 = vector.shape_cast %3 : vector<1x16x8x128xf32> to vector<16x8x128xf32>
    %5 = vector.broadcast %0 : vector<16x1x1xf32> to vector<16x8x128xf32>
    %6 = arith.mulf %5, %4 : vector<16x8x128xf32>
    %7 = arith.addf %2, %6 : vector<16x8x128xf32>
    %c1 = arith.constant 1 : index
    %c0_8 = arith.constant 0 : index
    %c0_9 = arith.constant 0 : index
    %c0_10 = arith.constant 0 : index
    %8 = vector.load %arg2[%c1, %c0_8, %c0_9, %c0_10] : memref<4x16x8x128xf32, #tpu.memory_space<vmem>>, vector<1x16x8x128xf32>
    %9 = vector.shape_cast %8 : vector<1x16x8x128xf32> to vector<16x8x128xf32>
    %10 = vector.broadcast %0 : vector<16x1x1xf32> to vector<16x8x128xf32>
    %11 = arith.mulf %10, %7 : vector<16x8x128xf32>
    %12 = arith.addf %9, %11 : vector<16x8x128xf32>
    %c0_11 = arith.constant 0 : index
    %c0_12 = arith.constant 0 : index
    %c0_13 = arith.constant 0 : index
    %c0_14 = arith.constant 0 : index
    %13 = vector.load %arg2[%c0_11, %c0_12, %c0_13, %c0_14] : memref<4x16x8x128xf32, #tpu.memory_space<vmem>>, vector<1x16x8x128xf32>
    %14 = vector.shape_cast %13 : vector<1x16x8x128xf32> to vector<16x8x128xf32>
    %15 = vector.broadcast %0 : vector<16x1x1xf32> to vector<16x8x128xf32>
    %16 = arith.mulf %15, %12 : vector<16x8x128xf32>
    %17 = arith.addf %14, %16 : vector<16x8x128xf32>
    %c0_15 = arith.constant 0 : index
    %c0_16 = arith.constant 0 : index
    %c0_17 = arith.constant 0 : index
    %18 = vector.load %arg3[%c0_15, %c0_16, %c0_17] : memref<16x8x128xf32, #tpu.memory_space<vmem>>, vector<16x8x128xf32>
    %19 = arith.addf %18, %17 : vector<16x8x128xf32>
    %20 = vector.shape_cast %19 : vector<16x8x128xf32> to vector<128x128xf32>
    %21 = arith.truncf %20 : vector<128x128xf32> to vector<128x128xbf16>
    %c384 = arith.constant 384 : index
    %c0_18 = arith.constant 0 : index
    %22 = vector.load %arg4[%c384, %c0_18] : memref<400x128xbf16, #tpu.memory_space<vmem>>, vector<16x128xbf16>
    %23 = arith.extf %22 : vector<16x128xbf16> to vector<16x128xf32>
    %c0_19 = arith.constant 0 : index
    %c0_20 = arith.constant 0 : index
    %24 = vector.load %arg4[%c0_19, %c0_20] : memref<400x128xbf16, #tpu.memory_space<vmem>>, vector<128x128xbf16>
    %cst = arith.constant dense<0.000000e+00> : vector<128x128xf32>
    %25 = tpu.matmul %21, %24, %cst {dimension_numbers = #tpu.dot_dimension_numbers<[1], [0], [0], [1], [0, 0, 1, 1], [], []>} : vector<128x128xbf16>, vector<128x128xbf16>, vector<128x128xf32> -> vector<128x128xf32>
    %26 = vector.extract_strided_slice %23 {offsets = [0, 0], sizes = [1, 128], strides = [1, 1]} : vector<16x128xf32> to vector<1x128xf32>
    %27 = vector.shape_cast %26 : vector<1x128xf32> to vector<128xf32>
    %28 = vector.shape_cast %27 : vector<128xf32> to vector<1x128xf32>
    %29 = vector.broadcast %28 : vector<1x128xf32> to vector<128x128xf32>
    %30 = arith.addf %25, %29 : vector<128x128xf32>
    %cst_21 = arith.constant 0.000000e+00 : f32
    %31 = vector.broadcast %cst_21 : f32 to vector<128x128xf32>
    %32 = arith.maximumf %30, %31 : vector<128x128xf32>
    %33 = arith.truncf %32 : vector<128x128xf32> to vector<128x128xbf16>
    %c128 = arith.constant 128 : index
    %c0_22 = arith.constant 0 : index
    %34 = vector.load %arg4[%c128, %c0_22] : memref<400x128xbf16, #tpu.memory_space<vmem>>, vector<128x128xbf16>
    %cst_23 = arith.constant dense<0.000000e+00> : vector<128x128xf32>
    %35 = tpu.matmul %33, %34, %cst_23 {dimension_numbers = #tpu.dot_dimension_numbers<[1], [0], [0], [1], [0, 0, 1, 1], [], []>} : vector<128x128xbf16>, vector<128x128xbf16>, vector<128x128xf32> -> vector<128x128xf32>
    %36 = vector.extract_strided_slice %23 {offsets = [1, 0], sizes = [1, 128], strides = [1, 1]} : vector<16x128xf32> to vector<1x128xf32>
    %37 = vector.shape_cast %36 : vector<1x128xf32> to vector<128xf32>
    %38 = vector.shape_cast %37 : vector<128xf32> to vector<1x128xf32>
    %39 = vector.broadcast %38 : vector<1x128xf32> to vector<128x128xf32>
    %40 = arith.addf %35, %39 : vector<128x128xf32>
    %cst_24 = arith.constant 0.000000e+00 : f32
    %41 = vector.broadcast %cst_24 : f32 to vector<128x128xf32>
    %42 = arith.maximumf %40, %41 : vector<128x128xf32>
    %43 = arith.truncf %42 : vector<128x128xf32> to vector<128x128xbf16>
    %c256 = arith.constant 256 : index
    %c0_25 = arith.constant 0 : index
    %44 = vector.load %arg4[%c256, %c0_25] : memref<400x128xbf16, #tpu.memory_space<vmem>>, vector<128x128xbf16>
    %cst_26 = arith.constant dense<0.000000e+00> : vector<128x128xf32>
    %45 = tpu.matmul %43, %44, %cst_26 {dimension_numbers = #tpu.dot_dimension_numbers<[1], [0], [0], [1], [0, 0, 1, 1], [], []>} : vector<128x128xbf16>, vector<128x128xbf16>, vector<128x128xf32> -> vector<128x128xf32>
    %46 = vector.extract_strided_slice %23 {offsets = [2, 0], sizes = [1, 128], strides = [1, 1]} : vector<16x128xf32> to vector<1x128xf32>
    %47 = vector.shape_cast %46 : vector<1x128xf32> to vector<128xf32>
    %48 = vector.shape_cast %47 : vector<128xf32> to vector<1x128xf32>
    %49 = vector.broadcast %48 : vector<1x128xf32> to vector<128x128xf32>
    %50 = arith.addf %45, %49 : vector<128x128xf32>
    %51 = vector.shape_cast %50 : vector<128x128xf32> to vector<16x8x128xf32>
    %c0_27 = arith.constant 0 : index
    %c0_28 = arith.constant 0 : index
    %c0_29 = arith.constant 0 : index
    %52 = vector.load %arg5[%c0_27, %c0_28, %c0_29] : memref<16x8x128xf32, #tpu.memory_space<vmem>>, vector<16x8x128xf32>
    tpu.vector_store %arg5[%c0_27, %c0_28, %c0_29], %51 {strides = array<i32>} : memref<16x8x128xf32, #tpu.memory_space<vmem>>, vector<16x8x128xf32>,
    return
  }
  func.func @transform_0(%arg0: i32) -> (i32, i32, i32) {
    %c0_i32 = arith.constant 0 : i32
    %c0_i32_0 = arith.constant 0 : i32
    %c0_i32_1 = arith.constant 0 : i32
    return %arg0, %c0_i32, %c0_i32_0 : i32, i32, i32
  }
  func.func @transform_1(%arg0: i32) -> (i32, i32, i32, i32) {
    %c0_i32 = arith.constant 0 : i32
    %c0_i32_0 = arith.constant 0 : i32
    %c0_i32_1 = arith.constant 0 : i32
    %c0_i32_2 = arith.constant 0 : i32
    return %c0_i32, %arg0, %c0_i32_0, %c0_i32_1 : i32, i32, i32, i32
  }
  func.func @transform_2(%arg0: i32) -> (i32, i32, i32) {
    %c0_i32 = arith.constant 0 : i32
    %c0_i32_0 = arith.constant 0 : i32
    %c0_i32_1 = arith.constant 0 : i32
    return %arg0, %c0_i32, %c0_i32_0 : i32, i32, i32
  }
  func.func @transform_3(%arg0: i32) -> (i32, i32) {
    %c0_i32 = arith.constant 0 : i32
    %c0_i32_0 = arith.constant 0 : i32
    %c0_i32_1 = arith.constant 0 : i32
    return %c0_i32, %c0_i32_0 : i32, i32
  }
  func.func @transform_4(%arg0: i32) -> (i32, i32, i32) {
    %c0_i32 = arith.constant 0 : i32
    %c0_i32_0 = arith.constant 0 : i32
    %c0_i32_1 = arith.constant 0 : i32
    return %arg0, %c0_i32, %c0_i32_0 : i32, i32, i32
  }
}

</mosaic_0001>

<bundles_post_ra>
// kernel: tpu_custom_call.1
= control target key start
LH: loop header
LB: loop body
LE: loop exit
PB: predicated region body
PF: predicated region fallthrough
CT: control target
= control target key end

     0   :  { %s2323_s0 = inlined_call_operand.vmem [shape: f32[32,1,1], index: 0, kind: input, shape index: {}]   ;;  %s2324_s1 = inlined_call_operand.hbm [shape: f32[4,32,8,128], index: 1, kind: input, shape index: {}]   ;;  %s2325_s2 = inlined_call_operand.hbm [shape: f32[32,8,128], index: 2, kind: input, shape index: {}]   ;;  %s2326_s3 = inlined_call_operand.hbm [shape: bf16[400,128], index: 3, kind: input, shape index: {}]   ;;  %s2327_s4 = inlined_call_operand.hbm [shape: f32[32,8,128], index: 4, kind: output, shape index: {}]  }
   0x1   :  { %2333 = sst [smem:[#allocation16_spill]] %s2324_s1 }
   0x2   :  { %2334 = sst [smem:[#allocation17_spill]] %s2326_s3 }
   0x3   :  { %9 = vsyncpa [#allocation3], 0 }
   0x4   :  { %11 = vsyncpa [#allocation3 + $0x1], 0 }
   0x5   :  { %12 = vsyncpa [#allocation6], 0 }
   0x6   :  { %14 = vsyncpa [#allocation6 + $0x1], 0 }
   0x7   :  { %15 = vsyncpa [#allocation4], 0 }
   0x8   :  { %17 = vsyncpa [#allocation4 + $0x1], 0  ;;  %s1917_s15 = smov 0   ;;  %s1919_s16 = smov 0  }
   0x9   :  { %s1921_s17 = smov 0   ;;  %s1923_s18 = smov 0  }
   0xa LB: > { %s1938_s19 = sadd.s32 4294967295, %s1874_s18   ;;  %s1370_s20 = sadd.s32 4294967294, %s1874_s18   ;;  %s1874_s18 = sphi %s1923_s18, %s2353_s18   ;;  %s1870_s17 = sphi %s1921_s17, %s2352_s17   ;;  %s1866_s16 = sphi %s1919_s16, %s2351_s16   ;;  %s1862_s15 = sphi %s1917_s15, %s2350_s15  }
   0xb   : > { %s1942_s21 = sadd.s32 1, %s1874_s18   ;;  %s56_s22 = sadd.s32 1, %s1870_s17 }
   0xc   : > { %s53_s23 = ssub.s32 %s1874_s18, %s1942_s21  ;;  %p63_p0 = scmp.ne.s32.totalorder %s1870_s17, %s1866_s16 }
   0xd   : > { %p54_p1 = scmp.eq.s32.totalorder %s53_s23, 0  ;;  %p64_p2 = scmp.eq.s32.totalorder %s1874_s18, 0 }
   0xe   : > { %p69_p3 = scmp.ne.s32.totalorder %s1866_s16, %s1862_s15  ;;  %p2328_p4 = scmp.eq.s32.totalorder %s1938_s19, 0 }
   0xf   : > { %s1954_s24 = scalar_select %p54_p1, %s1870_s17, %s56_s22  }
  0x10   : > { %p1956_p5 = por %p64_p2, %p63_p0  ;;  %p1962_p6 = por %p2328_p4, %p69_p3 }
  0x11   : > { %p140_p7 = scmp.eq.s32.totalorder %s1938_s19, 1  ;;  %p146_p8 = scmp.eq.s32.totalorder %s1370_s20, 1 }
  0x12   : > { %s2335_s25 = scalar_select %p1956_p5, 1, 0 }
  0x13   : > { %s2336_s26 = scalar_select %p1962_p6, 1, 0 }
  0x14   : > { %p1371_p9 = scmp.ge.s32.totalorder %s1874_s18, 1  ;;  %p153_p10 = scmp.lt.s32.totalorder %s1874_s18, 3 }
  0x15   : > { %p1969_p11 = por %p140_p7, %p63_p0  ;;  %p1973_p12 = por %p146_p8, %p69_p3 }
  0x16   : > { %p1977_p13 = pnand %p1371_p9, %p153_p10  ;;  %s1876_s30 = smov [#allocation7]  }
  0x17   : > { %s2337_s27 = scalar_select %p1969_p11, 1, 0 }
  0x18   : > { %s2338_s28 = scalar_select %p1973_p12, 1, 0 }
  0x19   : > { %s2339_s29 = scalar_select %p1977_p13, 1, 0 }
  0x1a   : > { %p1661_p1 = pneg %p1977_p13  ;;  %s165_s5 = sshll.u32 %s1876_s30, 4  ;;  %s166_s5 = int_to_ptr.vmem [resolvable:$true] %s165_s5 }
  0x1b   : > { %s2341_s3 = sld [smem:[#allocation17_spill]] }
  0x1c   : > { %p1985_p2 = pnand %p1661_p1, %p2328_p4 }
  0x1e   : > { %p1746_p3 = pneg %p1985_p2 }
  0x21   : > { %s1744_s9 = scalar_lea.hbm %s2341_s3, 3200 }
  0x22   : > { %p1745_p0 = scmp.ne.s32.totalorder %s2341_s3, %s1744_s9  ;;  %p1751_p9 = scmp.lt.u32.totalorder %s1744_s9, %s2341_s3 }
  0x24   : > { %p1747_p7 = pnand %p1746_p3, %p1745_p0 }
  0x26   : > { %p1748_p8 = pneg %p1747_p7 }
  0x28   : > { %p1753_p10 = pnand %p1751_p9, %p1748_p8 }
  0x2a   : > { %1756 = shalt.err (!%p1753_p10)
}
  0x2b   : > { %s1757_s14 = scalar_lea.vmem %s166_s5, 3200  ;;  %p1765_p11 = scmp.lt.s32.totalorder %s166_s5, %s166_s5 }
  0x2c   : > { %p1758_p1 = scmp.ne.s32.totalorder %s166_s5, %s1757_s14  ;;  %p1766_p6 = scmp.lt.s32.totalorder %s1757_s14, %s1757_s14 }
  0x2e   : > { %p1760_p4 = pnand %p1758_p1, %p1746_p3  ;;  %p1767_p13 = por %p1766_p6, %p1765_p11 }
  0x30   : > { %p1761_p12 = pneg %p1760_p4 }
  0x32   : > { %p1768_p5 = pnand %p1767_p13, %p1761_p12 }
  0x34   : > { %1771 = shalt.err (!%p1768_p5)
}
  0x35   : > { %s1877_s20 = smov 64   ;;  %s1878_s22 = smov 4  }
  0x36   : > { %1664 = dma.hbm_to_vmem [thread:$0]  (!%p1985_p2), %s2341_s3, 3200, %s166_s5, [#allocation6], %s1877_s20, %s1877_s20, %s1878_s22  }
  0x37   : > { %p1373_p0 = scmp.ge.s32.totalorder %s1874_s18, 2 }
  0x39   : > { %175 = sbr.rel (%p1373_p0) target bundleno = 104 (0x68), region = 20 }
  0x40   : > { %s187_s7 = sand.u32 1, %s1870_s17   ;;  %s1481_s8 = sshll.u32 %s1874_s18, 11 }
  0x41   : > { %s1374_s6 = sshll.u32 %s187_s7, 9  ;;  %s2342_s1 = sld [smem:[#allocation16_spill]] }
  0x42   : > { %p2343_p4 = scmp.ne.s32.totalorder %s2335_s25, 0  ;;  %s191_s12 = scalar_lea.vmem [#allocation2], %s1374_s6 }
  0x43   : > { %s210_s13 = sshll.u32 %s191_s12, 4  ;;  %s1879_s20 = smov 4096   ;;  %s211_s13 = int_to_ptr.vmem [resolvable:$true] %s210_s13 }
  0x44   : > { %s1646_s11 = scalar_select %p2343_p4, [#allocation0], [#allocation11] }
  0x45   : > { %1647 = sst [smem:[#allocation10]] (%p2343_p4), %s1879_s20  ;;  %s1880_s22 = smov 2048  }
  0x46   : > { %s202_s14 = sld [smem:[%s1646_s11]]   ;;  %s1881_s23 = smov 16  }
  0x47   : > { %s197_s5 = scalar_lea.hbm %s2342_s1, %s1481_s8  ;;  %1648 = sst [smem:[#allocation10 + $0x1]] (%p2343_p4), %s1880_s22 }
  0x48   : > { %1649 = sst [smem:[#allocation10 + $0x2]] (%p2343_p4), %s1881_s23  ;;  %s1882_s30 = smov 128  }
  0x49   : > { %1650 = sst [smem:[#allocation10 + $0x3]] (%p2343_p4), %s1882_s30  ;;  %s1883_s6 = smov 8  }
  0x4a   : > { %1651 = sst [smem:[#allocation10 + $0x4]] (%p2343_p4), %s1882_s30  ;;  %s188_s11 = scalar_lea.sflag [#allocation3], %s187_s7 }
  0x4b   : > { %1652 = sst [smem:[#allocation10 + $0x5]] (%p2343_p4), %s1883_s6  ;;  %s1884_s12 = smov [#allocation9]  }
  0x4c   : > { %s1377_s9 = sshll.u32 %s202_s14, 26  ;;  %s233_s20 = sand.u32 1, %s1874_s18  }
  0x4d   : > { %s1378_s10 = sadd.s32 134217728, %s1377_s9  ;;  %s1379_s22 = sshll.u32 %s187_s7, 7 }
  0x4e   : > { %1653 = dma.general (%p2343_p4), %s197_s5, 8192, %s211_s13, %s188_s11, %s1884_s12, [#allocation10], %s1378_s10, 0  }
  0x4f   : > { %s2033_s3 = scalar_lea.hbm %s2325_s2, %s1481_s8  ;;  %s237_s14 = scalar_lea.vmem [#allocation5], %s1379_s22 }
  0x50   : > { %s244_s30 = sshll.u32 %s237_s14, 4  ;;  %s2037_s9 = scalar_lea.sflag [#allocation6], %s233_s20  ;;  %s2035_s30 = int_to_ptr.vmem [resolvable:$true] %s244_s30 }
  0x51   : > { %s1772_s5 = scalar_lea.hbm %s2033_s3, 2048  ;;  %s1776_s1 = scalar_lea.hbm %s2325_s2, 4096 }
  0x52   : > { %p1773_p5 = scmp.ne.s32.totalorder %s2033_s3, %s1772_s5  ;;  %p1777_p12 = scmp.lt.u32.totalorder %s2033_s3, %s2325_s2 }
  0x53   : > { %p1778_p13 = scmp.lt.u32.totalorder %s1776_s1, %s1772_s5  ;;  %p1780_p3 = scmp.lt.u32.totalorder %s1772_s5, %s2033_s3 }
  0x54   : > { %p1774_p6 = pnand %p1773_p5, %p2343_p4 }
  0x55   : > { %p1779_p2 = por %p1778_p13, %p1777_p12 }
  0x56   : > { %p1775_p11 = pneg %p1774_p6 }
  0x57   : > { %p1781_p7 = por %p1780_p3, %p1779_p2 }
  0x59   : > { %p1782_p8 = pnand %p1781_p7, %p1775_p11 }
  0x5b   : > { %1785 = shalt.err (!%p1782_p8)
}
  0x5c   : > { %s1786_s10 = scalar_lea.vmem %s2035_s30, 2048  ;;  %s1885_s11 = smov [#allocation5]  }
  0x5d   : > { %p1787_p9 = scmp.ne.s32.totalorder %s2035_s30, %s1786_s10  ;;  %s1790_s12 = sshll.u32 %s1885_s11, 4  ;;  %s1791_s12 = int_to_ptr.vmem [resolvable:$false] %s1790_s12 }
  0x5e   : > { %s1792_s20 = scalar_lea.vmem %s1791_s12, 4096  ;;  %p1793_p5 = scmp.lt.s32.totalorder %s2035_s30, %s1791_s12 }
  0x5f   : > { %p1788_p10 = pnand %p1787_p9, %p2343_p4  ;;  %p1794_p6 = scmp.lt.s32.totalorder %s1792_s20, %s1786_s10 }
  0x61   : > { %p1789_p1 = pneg %p1788_p10  ;;  %p1795_p12 = por %p1794_p6, %p1793_p5 }
  0x63   : > { %p1796_p13 = pnand %p1795_p12, %p1789_p1 }
  0x65   : > { %1799 = shalt.err (!%p1796_p13)
}
  0x66   : > { %s1886_s22 = smov 128   ;;  %s1887_s23 = smov 8  }
  0x67   : > { %1654 = dma.hbm_to_vmem [thread:$0]  (%p2343_p4), %s2033_s3, 2048, %s2035_s30, %s2037_s9, %s1886_s22, %s1886_s22, %s1887_s23  }
  0x68 PF: > { %p2344_p11 = scmp.ne.s32.totalorder %s2339_s29, 0 }
  0x69   : > { %s2064_s14 = sand.u32 (!%p2344_p11), 1, %s1866_s16   ;;  %p2345_p2 = scmp.ne.s32.totalorder (!%p2344_p11), %s2336_s26, 0 }
  0x6a   : > { %256 = sbr.rel (%p2344_p11) target bundleno = 976 (0x3d0), region = 36  ;;  %s1383_s5 = sshll.u32 (!%p2344_p11), %s2064_s14, 9 }
  0x6b   : > { %s259_s7 = scalar_lea.sflag (!%p2344_p11), [#allocation3], %s2064_s14  ;;  %s2068_s13 = scalar_lea.vmem (!%p2344_p11), [#allocation2], %s1383_s5 }
  0x71   : > { %1845 = dma.done.wait (%p2345_p2), %s259_s7, 8192  }
  0x72   : > { %1847 = vsyncadd (%p2345_p2), %s259_s7, 4294959104  ;;  %s267_s3 = sand.u32 1, %s1938_s19   ;;  %s1384_s25 = sshll.u32 %s2064_s14, 7 }
  0x73   : > { %s268_s29 = scalar_lea.sflag [#allocation6], %s267_s3  ;;  %s2078_s30 = scalar_lea.vmem [#allocation5], %s1384_s25 }
  0x74   : > { %1849 = dma.done.wait (%p2345_p2), %s268_s29, 2048  }
  0x75   : > { %1851 = vsyncadd (%p2345_p2), %s268_s29, 4294965248  ;;  %p2346_p4 = scmp.eq.s32.totalorder %s1938_s19, 0 }
  0x77   : > { %1853 = dma.done.wait (%p2346_p4), [#allocation6], 3200   ;;  %p2347_p3 = pmov %p2346_p4 }
  0x78   : > { %s1387_s9 = sshll.u32 %s1938_s19, 4  ;;  %v1888_v0 = vmov 0   ;;  %v1720_v7 = vld [vmem:[#allocation7] sm:$0xff]   ;;  %v1721_v8 = vld [vmem:[#allocation7 + $0x8] sm:$0xff]   ;;  %v1722_v11 = vld [vmem:[#allocation7 + $0x10] sm:$0xff]   ;;  %s2254_s26 = scalar_lea.vmem [#allocation8], %s1384_s25 }
  0x79   : > { %1855 = vsyncadd (%p2347_p3), [#allocation6], 4294964096  ;;  %1719 = vset.pattern.permute.xlu1 %v1888_v0  ;;  %1718 = vset.pattern.permute.xlu0 %v1888_v0  ;;  %p310_p7 = scmp.lt.s32.totalorder %s1387_s9, 31  ;;  %v1723_v14 = vld [vmem:[#allocation7 + $0x18] sm:$0xff]   ;;  %v1724_v17 = vld [vmem:[#allocation7 + $0x20] sm:$0xff]   ;;  %s1483_s10 = sshll.u32 %s1938_s19, 11 }
  0x7a   : > { %1532 = vmatprep.subr.bf16.mxu0 %v1720_v7  ;;  %v1725_v20 = vld [vmem:[#allocation7 + $0x28] sm:$0xff]   ;;  %v1726_v23 = vld [vmem:[#allocation7 + $0x30] sm:$0xff]   ;;  %v1727_v24 = vld [vmem:[#allocation7 + $0x38] sm:$0xff]   ;;  %s1256_s11 = sshll.u32 %s2254_s26, 4  ;;  %s2274_s22 = scalar_lea.hbm %s2327_s4, %s1483_s10  ;;  %s2276_s11 = int_to_ptr.vmem [resolvable:$true] %s1256_s11 }
  0x7b   : > { %s2355_s9 = smov (!%p310_p7, %s1387_s9), 31  ;;  %1533 = vmatpush3.bf16.msra.mxu0 %v1720_v7  ;;  %v1728_v25 = vld [vmem:[#allocation7 + $0x40] sm:$0xff]   ;;  %v1729_v26 = vld [vmem:[#allocation7 + $0x48] sm:$0xff]   ;;  %v1730_v27 = vld [vmem:[#allocation7 + $0x50] sm:$0xff]   ;;  %s1243_s19 = scalar_lea.sflag [#allocation4], %s2064_s14 }
  0x7c   : > { %s2092_s6 = scalar_lea.vmem %s2323_s0, %s2355_s9  ;;  %1534 = vmatprep.subr.bf16.mxu0 %v1721_v8  ;;  %1564 = vmatprep.subr.bf16.mxu1 %v1728_v25  ;;  %v1731_v28 = vld [vmem:[#allocation7 + $0x58] sm:$0xff]   ;;  %v1732_v29 = vld [vmem:[#allocation7 + $0x60] sm:$0xff]   ;;  %v1733_v30 = vld [vmem:[#allocation7 + $0x68] sm:$0xff]   ;;  %s1800_s23 = scalar_lea.vmem %s2276_s11, 2048 }
  0x7d   : > { %v1422_v1 = vld [vmem:[%s2092_s6 + $0x2] ss:$0 sm:$0xff]  ;;  %v1420_v2 = vld [vmem:[%s2092_s6] ss:$0 sm:$0xff]  ;;  %v1423_v3 = vld [vmem:[%s2092_s6 + $0x3] ss:$0 sm:$0xff]  ;;  %1565 = vmatpush3.bf16.msra.mxu1 %v1728_v25  ;;  %p1801_p8 = scmp.ne.s32.totalorder %s2276_s11, %s1800_s23 }
  0x7e   : > { %457 = vperm.xlu1 %1719, %v1422_v1   ;;  %449 = vperm.xlu0 %1718, %v1420_v2   ;;  %v1421_v4 = vld [vmem:[%s2092_s6 + $0x1] ss:$0 sm:$0xff]  ;;  %v1425_v5 = vld [vmem:[%s2092_s6 + $0x5] ss:$0 sm:$0xff]  ;;  %v1424_v6 = vld [vmem:[%s2092_s6 + $0x4] ss:$0 sm:$0xff] }
  0x7f   : > { %v1427_v9 = vld [vmem:[%s2092_s6 + $0x7] ss:$0 sm:$0xff]  ;;  %v1426_v10 = vld [vmem:[%s2092_s6 + $0x6] ss:$0 sm:$0xff]  ;;  %v1429_v12 = vld [vmem:[%s2092_s6 + $0x9] ss:$0 sm:$0xff]  ;;  %1535 = vmatpush3.bf16.msra.mxu0 %v1721_v8  ;;  %1566 = vmatprep.subr.bf16.mxu1 %v1729_v26 }
  0x80   : > { %v1428_v13 = vld [vmem:[%s2092_s6 + $0x8] ss:$0 sm:$0xff]  ;;  %1536 = vmatprep.subr.bf16.mxu0 %v1722_v11  ;;  %v1431_v15 = vld [vmem:[%s2092_s6 + $0xb] ss:$0 sm:$0xff]  ;;  %v1430_v16 = vld [vmem:[%s2092_s6 + $0xa] ss:$0 sm:$0xff] }
  0x81   : > { %v1433_v18 = vld [vmem:[%s2092_s6 + $0xd] ss:$0 sm:$0xff]  ;;  %v1432_v19 = vld [vmem:[%s2092_s6 + $0xc] ss:$0 sm:$0xff]  ;;  %v1435_v21 = vld [vmem:[%s2092_s6 + $0xf] ss:$0 sm:$0xff]  ;;  %1567 = vmatpush3.bf16.msra.mxu1 %v1729_v26 }
  0x82   : > { %461 = vperm.xlu1 %1719, %v1423_v3   ;;  %453 = vperm.xlu0 %1718, %v1421_v4   ;;  %v1434_v22 = vld [vmem:[%s2092_s6 + $0xe] ss:$0 sm:$0xff]  ;;  %v1406_v31 = vld [vmem:[%s2068_s13 + $0x190] sm:$0xff]  ;;  %v1404_v32 = vld [vmem:[%s2068_s13 + $0x180] sm:$0xff]  ;;  %p2348_p9 = scmp.ne.s32.totalorder %s2337_s27, 0  ;;  %s1889_s5 = smov [#allocation8]  }
  0x83   : > { %1537 = vmatpush3.bf16.msra.mxu0 %v1722_v11  ;;  %1568 = vmatprep.subr.bf16.mxu1 %v1730_v27  ;;  %v1390_v33 = vld [vmem:[%s2068_s13 + $0x110] sm:$0xff]  ;;  %v1388_v35 = vld [vmem:[%s2068_s13 + $0x100] sm:$0xff]  ;;  %v1407_v39 = vld [vmem:[%s2068_s13 + $0x198] sm:$0xff]  ;;  %s1804_s7 = sshll.u32 %s1889_s5, 4  ;;  %s1805_s7 = int_to_ptr.vmem [resolvable:$false] %s1804_s7 }
  0x84   : > { %1538 = vmatprep.subr.bf16.mxu0 %v1723_v14  ;;  %v1405_v40 = vld [vmem:[%s2068_s13 + $0x188] sm:$0xff]  ;;  %v1438_v41 = vld [vmem:[%s2068_s13 + $0x90] sm:$0xff]  ;;  %v1436_v44 = vld [vmem:[%s2068_s13 + $0x80] sm:$0xff]  ;;  %p1802_p10 = pnand %p1801_p8, %p2348_p9  ;;  %p1807_p5 = scmp.lt.s32.totalorder %s2276_s11, %s1805_s7 }
  0x85   : > { %1569 = vmatpush3.bf16.msra.mxu1 %v1730_v27  ;;  %v1391_v45 = vld [vmem:[%s2068_s13 + $0x118] sm:$0xff]  ;;  %v1389_v47 = vld [vmem:[%s2068_s13 + $0x108] sm:$0xff]  ;;  %v1408_v58 = vld [vmem:[%s2068_s13 + $0x1a0] sm:$0xff] }
  0x86   : > { %469 = vperm.xlu1 %1719, %v1425_v5   ;;  %465 = vperm.xlu0 %1718, %v1424_v6   ;;  %v1409_v57 = vld [vmem:[%s2068_s13 + $0x1a8] sm:$0xff]  ;;  %v595_v59 = vld [vmem:[%s2068_s13 + $0x10] sm:$0xff]  ;;  %v1439_v60 = vld [vmem:[%s2068_s13 + $0x98] sm:$0xff]  ;;  %p1803_p1 = pneg %p1802_p10 }
  0x87   : > { %1539 = vmatpush3.bf16.msra.mxu0 %v1723_v14  ;;  %1570 = vmatprep.subr.bf16.mxu1 %v1731_v28  ;;  %v1437_v61 = vld [vmem:[%s2068_s13 + $0x88] sm:$0xff]  ;;  %v1392_v5 = vld [vmem:[%s2068_s13 + $0x120] sm:$0xff]  ;;  %v596_v11 = vld [vmem:[%s2068_s13 + $0x18] sm:$0xff] }
  0x88   : > { %1540 = vmatprep.subr.bf16.mxu0 %v1724_v17  ;;  %v1393_v4 = vld [vmem:[%s2068_s13 + $0x128] sm:$0xff]  ;;  %v593_v6 = vld [vmem:[%s2068_s13] sm:$0xff] }
  0x89   : > { %1571 = vmatpush3.bf16.msra.mxu1 %v1731_v28  ;;  %v1441_v14 = vld [vmem:[%s2068_s13 + $0xa8] sm:$0xff]  ;;  %v1440_v26 = vld [vmem:[%s2068_s13 + $0xa0] sm:$0xff] }
  0x8a   : > { %477 = vperm.xlu1 %1719, %v1427_v9   ;;  %473 = vperm.xlu0 %1718, %v1426_v10   ;;  %v1411_v9 = vld [vmem:[%s2068_s13 + $0x1b8] sm:$0xff]  ;;  %v1410_v10 = vld [vmem:[%s2068_s13 + $0x1b0] sm:$0xff] }
  0x8b   : > { %1541 = vmatpush3.bf16.msra.mxu0 %v1724_v17  ;;  %1572 = vmatprep.subr.bf16.mxu1 %v1732_v29 }
  0x8c   : > { %1542 = vmatprep.subr.bf16.mxu0 %v1725_v20 }
  0x8d   : > { %1573 = vmatpush3.bf16.msra.mxu1 %v1732_v29  ;;  %v641_v29 = vld [vmem:[%s2078_s30] sm:$0xff] }
  0x8e   : > { %485 = vperm.xlu1 %1719, %v1429_v12   ;;  %481 = vperm.xlu0 %1718, %v1428_v13  }
  0x8f   : > { %1543 = vmatpush3.bf16.msra.mxu0 %v1725_v20  ;;  %1574 = vmatprep.subr.bf16.mxu1 %v1733_v30  ;;  %v1394_v20 = vld [vmem:[%s2068_s13 + $0x130] sm:$0xff] }
  0x90   : > { %1544 = vmatprep.subr.bf16.mxu0 %v1726_v23 }
  0x91   : > { %1575 = vmatpush3.bf16.msra.mxu1 %v1733_v30  ;;  %v643_v30 = vld [vmem:[%s2078_s30 + $0x10] sm:$0xff] }
  0x92   : > { %493 = vperm.xlu1 %1719, %v1431_v15   ;;  %489 = vperm.xlu0 %1718, %v1430_v16  }
  0x93   : > { %1545 = vmatpush3.bf16.msra.mxu0 %v1726_v23 }
  0x94   : > { %1546 = vmatprep.subr.bf16.mxu0 %v1727_v24 }
  0x96   : > { %501 = vperm.xlu1 %1719, %v1433_v18   ;;  %497 = vperm.xlu0 %1718, %v1432_v19   ;;  %v1395_v18 = vld [vmem:[%s2068_s13 + $0x138] sm:$0xff] }
  0x97   : > { %1547 = vmatpush3.bf16.msra.mxu0 %v1727_v24 }
  0x9a   : > { %509 = vperm.xlu1 %1719, %v1435_v21   ;;  %505 = vperm.xlu0 %1718, %v1434_v22   ;;  %v594_v22 = vld [vmem:[%s2068_s13 + $0x8] sm:$0xff] }
  0xfd   : > { %v458_v34 = vpop.permute.xlu1 %457  ;;  %v450_v36 = vpop.permute.xlu0 %449 }
  0xfe   : > { %v514_v37 = vmul.f32 %v1406_v31, %v458_v34  ;;  %v512_v38 = vmul.f32 %v1404_v32, %v450_v36 }
 0x100   : > { %v530_v42 = vadd.f32 %v1390_v33, %v514_v37  ;;  %v528_v43 = vadd.f32 %v1388_v35, %v512_v38  ;;  %v1413_v33 = vld [vmem:[%s2068_s13 + $0x1c8] sm:$0xff] }
 0x101   : > { %v462_v46 = vpop.permute.xlu1 %461  ;;  %v454_v48 = vpop.permute.xlu0 %453 }
 0x102   : > { %v563_v49 = vmul.f32 %v530_v42, %v458_v34  ;;  %v561_v50 = vmul.f32 %v528_v43, %v450_v36  ;;  %v515_v51 = vmul.f32 %v1407_v39, %v462_v46  ;;  %v513_v52 = vmul.f32 %v1405_v40, %v454_v48  ;;  %v642_v40 = vld [vmem:[%s2078_s30 + $0x8] sm:$0xff] }
 0x104   : > { %v579_v53 = vadd.f32 %v1438_v41, %v563_v49  ;;  %v577_v54 = vadd.f32 %v1436_v44, %v561_v50  ;;  %v531_v55 = vadd.f32 %v1391_v45, %v515_v51  ;;  %v529_v56 = vadd.f32 %v1389_v47, %v513_v52  ;;  %v644_v41 = vld [vmem:[%s2078_s30 + $0x18] sm:$0xff]  ;;  %v1442_v44 = vld [vmem:[%s2068_s13 + $0xb0] sm:$0xff]  ;;  %v1397_v45 = vld [vmem:[%s2068_s13 + $0x148] sm:$0xff] }
 0x105   : > { %v470_v62 = vpop.permute.xlu1 %469  ;;  %v466_v63 = vpop.permute.xlu0 %465  ;;  %v1396_v47 = vld [vmem:[%s2068_s13 + $0x140] sm:$0xff]  ;;  %v598_v51 = vld [vmem:[%s2068_s13 + $0x28] sm:$0xff] }
 0x106   : > { %v611_v0 = vmul.f32 %v579_v53, %v458_v34  ;;  %v609_v1 = vmul.f32 %v577_v54, %v450_v36  ;;  %v564_v2 = vmul.f32 %v531_v55, %v462_v46  ;;  %v562_v3 = vmul.f32 %v529_v56, %v454_v48  ;;  %v1412_v34 = vld [vmem:[%s2068_s13 + $0x1c0] sm:$0xff]  ;;  %v1443_v36 = vld [vmem:[%s2068_s13 + $0xb8] sm:$0xff] }
 0x107   : > { %v517_v7 = vmul.f32 %v1409_v57, %v470_v62  ;;  %v516_v8 = vmul.f32 %v1408_v58, %v466_v63  ;;  %v597_v52 = vld [vmem:[%s2068_s13 + $0x20] sm:$0xff] }
 0x108   : > { %v580_v12 = vadd.f32 %v1439_v60, %v564_v2  ;;  %v578_v13 = vadd.f32 %v1437_v61, %v562_v3  ;;  %v627_v15 = vadd.f32 %v611_v0, %v595_v59  ;;  %v625_v23 = vadd.f32 %v609_v1, %v593_v6  ;;  %v600_v59 = vld [vmem:[%s2068_s13 + $0x38] sm:$0xff]  ;;  %v645_v6 = vld [vmem:[%s2078_s30 + $0x20] sm:$0xff] }
 0x109   : > { %v533_v16 = vadd.f32 %v1393_v4, %v517_v7  ;;  %v532_v17 = vadd.f32 %v1392_v5, %v516_v8  ;;  %v478_v19 = vpop.permute.xlu1 %477  ;;  %v474_v21 = vpop.permute.xlu0 %473  ;;  %v1415_v60 = vld [vmem:[%s2068_s13 + $0x1d8] sm:$0xff]  ;;  %v1414_v5 = vld [vmem:[%s2068_s13 + $0x1d0] sm:$0xff]  ;;  %v646_v7 = vld [vmem:[%s2078_s30 + $0x28] sm:$0xff] }
 0x10a   : > { %v612_v24 = vmul.f32 %v580_v12, %v462_v46  ;;  %v610_v25 = vmul.f32 %v578_v13, %v454_v48  ;;  %v519_v27 = vmul.f32 %v1411_v9, %v478_v19  ;;  %v518_v28 = vmul.f32 %v1410_v10, %v474_v21  ;;  %v599_v10 = vld [vmem:[%s2068_s13 + $0x30] sm:$0xff] }
 0x10b   : > { %v566_v31 = vmul.f32 %v533_v16, %v470_v62  ;;  %v565_v32 = vmul.f32 %v532_v17, %v466_v63  ;;  %v657_v49 = vadd.f32 %v641_v29, %v625_v23  ;;  %v659_v50 = vadd.f32 %v643_v30, %v627_v15  ;;  %v602_v29 = vld [vmem:[%s2068_s13 + $0x48] sm:$0xff] }
 0x10c   : > { %v628_v35 = vadd.f32 %v612_v24, %v596_v11  ;;  %v535_v37 = vadd.f32 %v1395_v18, %v519_v27  ;;  %v534_v38 = vadd.f32 %v1394_v20, %v518_v28  ;;  %v626_v39 = vadd.f32 %v610_v25, %v594_v22  ;;  %v1399_v20 = vld [vmem:[%s2068_s13 + $0x158] sm:$0xff]  ;;  %v1398_v22 = vld [vmem:[%s2068_s13 + $0x150] sm:$0xff]  ;;  %v1417_v25 = vld [vmem:[%s2068_s13 + $0x1e8] sm:$0xff] }
 0x10d   : > { %v582_v42 = vadd.f32 %v1441_v14, %v566_v31  ;;  %v581_v43 = vadd.f32 %v1440_v26, %v565_v32  ;;  %v486_v46 = vpop.permute.xlu1 %485  ;;  %v482_v48 = vpop.permute.xlu0 %481  ;;  %v1416_v26 = vld [vmem:[%s2068_s13 + $0x1e0] sm:$0xff]  ;;  %v647_v32 = vld [vmem:[%s2078_s30 + $0x30] sm:$0xff] }
 0x10e   : > { %v568_v53 = vmul.f32 %v535_v37, %v478_v19  ;;  %v567_v54 = vmul.f32 %v534_v38, %v474_v21  ;;  %v521_v55 = vmul.f32 %v1413_v33, %v486_v46  ;;  %v520_v56 = vmul.f32 %v1412_v34, %v482_v48  ;;  %v648_v33 = vld [vmem:[%s2078_s30 + $0x38] sm:$0xff]  ;;  %v601_v34 = vld [vmem:[%s2068_s13 + $0x40] sm:$0xff]  ;;  %v1401_v37 = vld [vmem:[%s2068_s13 + $0x168] sm:$0xff] }
 0x10f   : > { %v614_v57 = vmul.f32 %v582_v42, %v470_v62  ;;  %v613_v58 = vmul.f32 %v581_v43, %v466_v63  ;;  %v658_v61 = vadd.f32 %v642_v40, %v626_v39  ;;  %v660_v0 = vadd.f32 %v644_v41, %v628_v35  ;;  %v1445_v62 = vld [vmem:[%s2068_s13 + $0xc8] sm:$0xff]  ;;  %v1444_v63 = vld [vmem:[%s2068_s13 + $0xc0] sm:$0xff] }
 0x110   : > { %v584_v1 = vadd.f32 %v1443_v36, %v568_v53  ;;  %v583_v2 = vadd.f32 %v1442_v44, %v567_v54  ;;  %v537_v3 = vadd.f32 %v1397_v45, %v521_v55  ;;  %v536_v4 = vadd.f32 %v1396_v47, %v520_v56  ;;  %v1400_v39 = vld [vmem:[%s2068_s13 + $0x160] sm:$0xff]  ;;  %v1447_v44 = vld [vmem:[%s2068_s13 + $0xd8] sm:$0xff]  ;;  %v1446_v45 = vld [vmem:[%s2068_s13 + $0xd0] sm:$0xff] }
 0x111   : > { %v630_v8 = vadd.f32 %v614_v57, %v598_v51  ;;  %v629_v9 = vadd.f32 %v613_v58, %v597_v52  ;;  %v2156_v11 = vpop.permute.xlu1 %493  ;;  %v2158_v12 = vpop.permute.xlu0 %489  ;;  %v673_v13 = vpack.c.bf16 %v658_v61, %v657_v49  ;;  %v674_v14 = vpack.c.bf16 %v660_v0, %v659_v50  ;;  %v1419_v52 = vld [vmem:[%s2068_s13 + $0x1f8] sm:$0xff]  ;;  %v1418_v53 = vld [vmem:[%s2068_s13 + $0x1f0] sm:$0xff]  ;;  %v1449_v56 = vld [vmem:[%s2068_s13 + $0xe8] sm:$0xff] }
 0x112   : > { %v616_v15 = vmul.f32 %v584_v1, %v478_v19  ;;  %v615_v16 = vmul.f32 %v583_v2, %v474_v21  ;;  %v570_v17 = vmul.f32 %v537_v3, %v486_v46  ;;  %v569_v18 = vmul.f32 %v536_v4, %v482_v48  ;;  %v1448_v1 = vld [vmem:[%s2068_s13 + $0xe0] sm:$0xff]  ;;  %v1403_v2 = vld [vmem:[%s2068_s13 + $0x178] sm:$0xff]  ;;  %v1402_v4 = vld [vmem:[%s2068_s13 + $0x170] sm:$0xff] }
 0x113   : > { %v523_v23 = vmul.f32 %v1415_v60, %v2156_v11  ;;  %v522_v24 = vmul.f32 %v1414_v5, %v2158_v12  ;;  %1548 = vmatprep.mubr.bf16.mxu0 %v673_v13  ;;  %v661_v27 = vadd.f32 %v645_v6, %v629_v9  ;;  %v662_v28 = vadd.f32 %v646_v7, %v630_v8  ;;  %v650_v60 = vld [vmem:[%s2078_s30 + $0x48] sm:$0xff]  ;;  %v604_v7 = vld [vmem:[%s2068_s13 + $0x58] sm:$0xff]  ;;  %v603_v8 = vld [vmem:[%s2068_s13 + $0x50] sm:$0xff] }
 0x114   : > { %v632_v19 = vadd.f32 %v616_v15, %v600_v59  ;;  %v631_v21 = vadd.f32 %v615_v16, %v599_v10  ;;  %v586_v30 = vadd.f32 %v1445_v62, %v570_v17  ;;  %v585_v31 = vadd.f32 %v1444_v63, %v569_v18  ;;  %1549 = vmatmul.mubr.bf16.vlgmr.msra.gmra.mrb[0].mxu0 %v674_v14  ;;  %v649_v59 = vld [vmem:[%s2078_s30 + $0x40] sm:$0xff]  ;;  %v606_v17 = vld [vmem:[%s2068_s13 + $0x68] sm:$0xff] }
 0x115   : > { %v539_v35 = vadd.f32 %v1399_v20, %v523_v23  ;;  %v538_v36 = vadd.f32 %v1398_v22, %v522_v24  ;;  %v502_v38 = vpop.permute.xlu1 %501  ;;  %v498_v40 = vpop.permute.xlu0 %497  ;;  %v675_v41 = vpack.c.bf16 %v662_v28, %v661_v27  ;;  %v651_v24 = vld [vmem:[%s2078_s30 + $0x50] sm:$0xff]  ;;  %v605_v28 = vld [vmem:[%s2068_s13 + $0x60] sm:$0xff] }
 0x116   : > { %v618_v42 = vmul.f32 %v586_v30, %v486_v46  ;;  %v617_v43 = vmul.f32 %v585_v31, %v482_v48  ;;  %v525_v47 = vmul.f32 %v1417_v25, %v502_v38  ;;  %v524_v49 = vmul.f32 %v1416_v26, %v498_v40  ;;  %v652_v25 = vld [vmem:[%s2078_s30 + $0x58] sm:$0xff] }
 0x117   : > { %v572_v50 = vmul.f32 %v539_v35, %v2156_v11  ;;  %v571_v51 = vmul.f32 %v538_v36, %v2158_v12  ;;  %1552 = vmatprep.mubr.bf16.mxu0 %v675_v41  ;;  %v663_v54 = vadd.f32 %v647_v32, %v631_v21  ;;  %v664_v55 = vadd.f32 %v648_v33, %v632_v19  ;;  %v1451_v19 = vld [vmem:[%s2068_s13 + $0xf8] sm:$0xff]  ;;  %v654_v35 = vld [vmem:[%s2078_s30 + $0x68] sm:$0xff] }
 0x118   : > { %v634_v46 = vadd.f32 %v618_v42, %v602_v29  ;;  %v633_v48 = vadd.f32 %v617_v43, %v601_v34  ;;  %v541_v57 = vadd.f32 %v1401_v37, %v525_v47  ;;  %v540_v58 = vadd.f32 %v1400_v39, %v524_v49  ;;  %v653_v34 = vld [vmem:[%s2078_s30 + $0x60] sm:$0xff]  ;;  %v608_v42 = vld [vmem:[%s2068_s13 + $0x78] sm:$0xff]  ;;  %v607_v43 = vld [vmem:[%s2068_s13 + $0x70] sm:$0xff] }
 0x119   : > { %v588_v61 = vadd.f32 %v1447_v44, %v572_v50  ;;  %v587_v0 = vadd.f32 %v1446_v45, %v571_v51  ;;  %v510_v3 = vpop.permute.xlu1 %509  ;;  %v506_v5 = vpop.permute.xlu0 %505  ;;  %v676_v6 = vpack.c.bf16 %v664_v55, %v663_v54  ;;  %v656_v49 = vld [vmem:[%s2078_s30 + $0x78] sm:$0xff]  ;;  %v655_v50 = vld [vmem:[%s2078_s30 + $0x70] sm:$0xff] }
 0x11a   : > { %v574_v9 = vmul.f32 %v541_v57, %v502_v38  ;;  %v573_v10 = vmul.f32 %v540_v58, %v498_v40  ;;  %v527_v62 = vmul.f32 %v1419_v52, %v510_v3  ;;  %v526_v63 = vmul.f32 %v1418_v53, %v506_v5  ;;  %v1736_v57 = vld [vmem:[#allocation7 + $0x80] sm:$0xff]   ;;  %v1737_v58 = vld [vmem:[#allocation7 + $0x88] sm:$0xff]  }
 0x11b   : > { %v620_v13 = vmul.f32 %v588_v61, %v2156_v11  ;;  %v619_v14 = vmul.f32 %v587_v0, %v2158_v12  ;;  %v665_v15 = vadd.f32 %v649_v59, %v633_v48  ;;  %v666_v16 = vadd.f32 %v650_v60, %v634_v46  ;;  %v1450_v11 = vld [vmem:[%s2068_s13 + $0xf0] sm:$0xff]  ;;  %1596 = vmatprep.subr.bf16.mxu0 %v1736_v57  ;;  %v2203_v60 = vld [vmem:[#allocation7 + $0x98] sm:$0xff]   ;;  %v2207_v61 = vld [vmem:[#allocation7 + $0xa0] sm:$0xff]   ;;  %s1806_s13 = scalar_lea.vmem %s1805_s7, 4096 }
 0x11c   : > { %v590_v18 = vadd.f32 %v1449_v56, %v574_v9  ;;  %v589_v20 = vadd.f32 %v1448_v1, %v573_v10  ;;  %v543_v22 = vadd.f32 %v1403_v2, %v527_v62  ;;  %v542_v23 = vadd.f32 %v1402_v4, %v526_v63  ;;  %1553 = vmatmul.mubr.bf16.gmra.mrb[4].mxu0 %v676_v6  ;;  %v1734_v48 = vld [vmem:[#allocation7 + $0x70] sm:$0xff]   ;;  %v1735_v56 = vld [vmem:[#allocation7 + $0x78] sm:$0xff]   ;;  %v2211_v0 = vld [vmem:[#allocation7 + $0xa8] sm:$0xff]   ;;  %p1808_p6 = scmp.lt.s32.totalorder %s1806_s13, %s1800_s23 }
 0x11d   : > { %v636_v26 = vadd.f32 %v620_v13, %v604_v7  ;;  %v635_v27 = vadd.f32 %v619_v14, %v603_v8  ;;  %v677_v12 = vpack.c.bf16 %v666_v16, %v665_v15  ;;  %1576 = vmatprep.subr.bf16.mxu1 %v1734_v48  ;;  %1597 = vmatpush3.bf16.msra.mxu0 %v1736_v57  ;;  %v2200_v59 = vld [vmem:[#allocation7 + $0x90] sm:$0xff]   ;;  %v699_v1 = vlaneseq }
 0x11e   : > { %v622_v21 = vmul.f32 %v590_v18, %v502_v38  ;;  %v621_v29 = vmul.f32 %v589_v20, %v498_v40  ;;  %v576_v30 = vmul.f32 %v543_v22, %v510_v3  ;;  %v575_v31 = vmul.f32 %v542_v23, %v506_v5  ;;  %1577 = vmatpush3.bf16.msra.mxu1 %v1734_v48  ;;  %p1809_p12 = por %p1808_p6, %p1807_p5 }
 0x11f   : > { %1556 = vmatprep.mubr.bf16.mxu0 %v677_v12  ;;  %v667_v32 = vadd.f32 %v651_v24, %v635_v27  ;;  %v668_v33 = vadd.f32 %v652_v25, %v636_v26  ;;  %1578 = vmatprep.subr.bf16.mxu1 %v1735_v56  ;;  %v2216_v2 = vshrl.u32 %v699_v1, 7  ;;  %v1742_v1 = vld [vmem:[#allocation7 + $0xb0] sm:$0xff]  }
 0x120   : > { %v638_v36 = vadd.f32 %v622_v21, %v606_v17  ;;  %v637_v37 = vadd.f32 %v621_v29, %v605_v28  ;;  %v592_v39 = vadd.f32 %v1451_v19, %v576_v30  ;;  %v591_v41 = vadd.f32 %v1450_v11, %v575_v31  ;;  %1598 = vmatprep.subr.bf16.mxu0 %v1737_v58  ;;  %p1810_p13 = pnand %p1809_p12, %p1803_p1 }
 0x121   : > { %v678_v44 = vpack.c.bf16 %v668_v33, %v667_v32  ;;  %1599 = vmatpush3.bf16.msra.mxu0 %v1737_v58 }
 0x122   : > { %v624_v45 = vmul.f32 %v592_v39, %v510_v3  ;;  %v623_v47 = vmul.f32 %v591_v41, %v506_v5  ;;  %v669_v38 = vadd.f32 %v653_v34, %v637_v37  ;;  %v670_v40 = vadd.f32 %v654_v35, %v638_v36  ;;  %1579 = vmatpush3.bf16.msra.mxu1 %v1735_v56  ;;  %v681_v3 = vld [vmem:[#allocation7 + $0xc0] sm:$0xf] }
 0x123   : > { %1628 = vmatprep.subr.bf16.mxu1 %v1736_v57  ;;  %1600 = vmatprep.subr.bf16.mxu0 %v2200_v59  ;;  %v2218_v4 = vunpack.c.l.bf16 %v681_v3  ;;  %v701_v5 = vsub.s32 0, %v2216_v2  ;;  %v1743_v3 = vld [vmem:[#allocation7 + $0xb8] sm:$0xff]  }
 0x124   : > { %v640_v51 = vadd.f32 %v624_v45, %v608_v42  ;;  %v639_v52 = vadd.f32 %v623_v47, %v607_v43  ;;  %1557 = vmatmul.mubr.bf16.gmra.mrb[8].mxu0 %v678_v44  ;;  %v679_v53 = vpack.c.bf16 %v670_v40, %v669_v38 }
 0x125   : > { %1601 = vmatpush3.bf16.msra.mxu0 %v2200_v59  ;;  %v2222_v6 = vrot.slane %v2218_v4, %v701_v5 }
 0x126   : > { %v672_v54 = vadd.f32 %v656_v49, %v640_v51  ;;  %v671_v55 = vadd.f32 %v655_v50, %v639_v52  ;;  %1560 = vmatprep.mubr.bf16.mxu0 %v679_v53  ;;  %1602 = vmatprep.subr.bf16.mxu0 %v2203_v60 }
 0x128   : > { %v680_v46 = vpack.c.bf16 %v672_v54, %v671_v55 }
 0x129   : > { %1603 = vmatpush3.bf16.msra.mxu0 %v2203_v60 }
 0x12a   : > { %1604 = vmatprep.subr.bf16.mxu0 %v2207_v61 }
 0x12c   : > { %1561 = vmatmul.mubr.bf16.gmra.mrb[12].mxu0 %v680_v46 }
 0x12d   : > { %1605 = vmatpush3.bf16.msra.mxu0 %v2207_v61 }
 0x12e   : > { %1606 = vmatprep.subr.bf16.mxu0 %v2211_v0 }
 0x131   : > { %1607 = vmatpush3.bf16.msra.mxu0 %v2211_v0 }
 0x132   : > { %1608 = vmatprep.subr.bf16.mxu0 %v1742_v1 }
 0x135   : > { %1609 = vmatpush3.bf16.msra.mxu0 %v1742_v1 }
 0x136   : > { %1610 = vmatprep.subr.bf16.mxu0 %v1743_v3 }
 0x139   : > { %1611 = vmatpush3.bf16.msra.mxu0 %v1743_v3 }
 0x1e7   : > { %v1550_v7 = vpop.f32.mrb[0].mxu0 }
 0x1e8   : > { %v794_v8 = vadd.f32 %v1550_v7, %v2222_v6  ;;  %v785_v9 = vpop.f32.mrb[1].mxu0 }
 0x1e9   : > { %v786_v10 = vadd.f32 %v785_v9, %v2222_v6  ;;  %v1551_v62 = vpop.f32.mrb[2].mxu0 }
 0x1ea   : > { %v797_v63 = vadd.f32 %v1551_v62, %v2222_v6  ;;  %v788_v13 = vpop.f32.mrb[3].mxu0  ;;  %v850_v15 = vmax.f32 %v794_v8, 0.0 }
 0x1eb   : > { %v789_v14 = vadd.f32 %v788_v13, %v2222_v6  ;;  %v848_v17 = vmax.f32 %v786_v10, 0.0 }
 0x1ec   : > { %v851_v16 = vmax.f32 %v797_v63, 0.0 }
 0x1ed   : > { %v849_v18 = vmax.f32 %v789_v14, 0.0 }
 0x1ee   : > { %v865_v20 = vpack.c.bf16 %v851_v16, %v850_v15 }
 0x1ef   : > { %v1554_v22 = vpop.f32.mrb[4].mxu0  ;;  %v864_v23 = vpack.c.bf16 %v849_v18, %v848_v17 }
 0x1f0   : > { %v810_v24 = vadd.f32 %v1554_v22, %v2222_v6  ;;  %v801_v25 = vpop.f32.mrb[5].mxu0 }
 0x1f1   : > { %v802_v26 = vadd.f32 %v801_v25, %v2222_v6  ;;  %v1555_v27 = vpop.f32.mrb[6].mxu0  ;;  %1580 = vmatprep.mubr.bf16.mxu1 %v864_v23 }
 0x1f2   : > { %v813_v28 = vadd.f32 %v1555_v27, %v2222_v6  ;;  %v804_v19 = vpop.f32.mrb[7].mxu0  ;;  %1581 = vmatmul.mubr.bf16.vlgmr.msra.gmra.mrb[0].mxu1 %v865_v20  ;;  %v854_v12 = vmax.f32 %v810_v24, 0.0 }
 0x1f3   : > { %v805_v11 = vadd.f32 %v804_v19, %v2222_v6  ;;  %1636 = vmatpush3.bf16.msra.mxu1 %v1736_v57  ;;  %v852_v29 = vmax.f32 %v802_v26, 0.0 }
 0x1f4   : > { %v855_v21 = vmax.f32 %v813_v28, 0.0  ;;  %1629 = vmatprep.subr.bf16.mxu1 %v1737_v58 }
 0x1f5   : > { %v853_v30 = vmax.f32 %v805_v11, 0.0 }
 0x1f6   : > { %v867_v31 = vpack.c.bf16 %v855_v21, %v854_v12 }
 0x1f7   : > { %v866_v32 = vpack.c.bf16 %v853_v30, %v852_v29  ;;  %v1558_v33 = vpop.f32.mrb[8].mxu0  ;;  %1637 = vmatpush3.bf16.msra.mxu1 %v1737_v58 }
 0x1f8   : > { %v826_v34 = vadd.f32 %v1558_v33, %v2222_v6  ;;  %v817_v35 = vpop.f32.mrb[9].mxu0  ;;  %1630 = vmatprep.subr.bf16.mxu1 %v2200_v59 }
 0x1f9   : > { %v818_v36 = vadd.f32 %v817_v35, %v2222_v6  ;;  %v1559_v37 = vpop.f32.mrb[10].mxu0  ;;  %1584 = vmatprep.mubr.bf16.mxu1 %v866_v32 }
 0x1fa   : > { %v829_v39 = vadd.f32 %v1559_v37, %v2222_v6  ;;  %v820_v41 = vpop.f32.mrb[11].mxu0  ;;  %1585 = vmatmul.mubr.bf16.gmra.mrb[4].mxu1 %v867_v31  ;;  %v858_v43 = vmax.f32 %v826_v34, 0.0 }
 0x1fb   : > { %v821_v42 = vadd.f32 %v820_v41, %v2222_v6  ;;  %1638 = vmatpush3.bf16.msra.mxu1 %v2200_v59  ;;  %v856_v45 = vmax.f32 %v818_v36, 0.0 }
 0x1fc   : > { %v859_v44 = vmax.f32 %v829_v39, 0.0  ;;  %1631 = vmatprep.subr.bf16.mxu1 %v2203_v60 }
 0x1fd   : > { %v857_v47 = vmax.f32 %v821_v42, 0.0 }
 0x1fe   : > { %v869_v38 = vpack.c.bf16 %v859_v44, %v858_v43 }
 0x1ff   : > { %v868_v40 = vpack.c.bf16 %v857_v47, %v856_v45  ;;  %v1562_v49 = vpop.f32.mrb[12].mxu0  ;;  %1639 = vmatpush3.bf16.msra.mxu1 %v2203_v60 }
 0x200   : > { %v842_v50 = vadd.f32 %v1562_v49, %v2222_v6  ;;  %v833_v51 = vpop.f32.mrb[13].mxu0  ;;  %1632 = vmatprep.subr.bf16.mxu1 %v2207_v61 }
 0x201   : > { %v834_v52 = vadd.f32 %v833_v51, %v2222_v6  ;;  %v1563_v53 = vpop.f32.mrb[14].mxu0  ;;  %1588 = vmatprep.mubr.bf16.mxu1 %v868_v40 }
 0x202   : > { %v845_v54 = vadd.f32 %v1563_v53, %v2222_v6  ;;  %v836_v55 = vpop.f32.mrb[15].mxu0  ;;  %1589 = vmatmul.mubr.bf16.gmra.mrb[8].mxu1 %v869_v38  ;;  %v862_v48 = vmax.f32 %v842_v50, 0.0 }
 0x203   : > { %v837_v46 = vadd.f32 %v836_v55, %v2222_v6  ;;  %1640 = vmatpush3.bf16.msra.mxu1 %v2207_v61  ;;  %v860_v57 = vmax.f32 %v834_v52, 0.0  ;;  %v890_v61 = vsub.s32 1, %v2216_v2 }
 0x204   : > { %v863_v56 = vmax.f32 %v845_v54, 0.0  ;;  %1633 = vmatprep.subr.bf16.mxu1 %v2211_v0 }
 0x205   : > { %v861_v58 = vmax.f32 %v837_v46, 0.0  ;;  %v891_v5 = vrot.slane %v2218_v4, %v890_v61 }
 0x206   : > { %v871_v59 = vpack.c.bf16 %v863_v56, %v862_v48 }
 0x207   : > { %v870_v60 = vpack.c.bf16 %v861_v58, %v860_v57  ;;  %1641 = vmatpush3.bf16.msra.mxu1 %v2211_v0 }
 0x208   : > { %1634 = vmatprep.subr.bf16.mxu1 %v1742_v1 }
 0x209   : > { %1592 = vmatprep.mubr.bf16.mxu1 %v870_v60 }
 0x20a   : > { %1593 = vmatmul.mubr.bf16.gmra.mrb[12].mxu1 %v871_v59  ;;  %v1079_v59 = vsub.s32 2, %v2216_v2 }
 0x20b   : > { %1642 = vmatpush3.bf16.msra.mxu1 %v1742_v1 }
 0x20c   : > { %1635 = vmatprep.subr.bf16.mxu1 %v1743_v3  ;;  %v1080_v60 = vrot.slane %v2218_v4, %v1079_v59 }
 0x20f   : > { %1643 = vmatpush3.bf16.msra.mxu1 %v1743_v3 }
 0x2c5   : > { %v1582_v6 = vpop.f32.mrb[0].mxu1 }
 0x2c6   : > { %v983_v7 = vadd.f32 %v1582_v6, %v891_v5  ;;  %v974_v8 = vpop.f32.mrb[1].mxu1 }
 0x2c7   : > { %v975_v0 = vadd.f32 %v974_v8, %v891_v5  ;;  %v1583_v9 = vpop.f32.mrb[2].mxu1 }
 0x2c8   : > { %v986_v10 = vadd.f32 %v1583_v9, %v891_v5  ;;  %v977_v62 = vpop.f32.mrb[3].mxu1  ;;  %v1039_v13 = vmax.f32 %v983_v7, 0.0 }
 0x2c9   : > { %v978_v63 = vadd.f32 %v977_v62, %v891_v5  ;;  %v1037_v15 = vmax.f32 %v975_v0, 0.0 }
 0x2ca   : > { %v1040_v14 = vmax.f32 %v986_v10, 0.0 }
 0x2cb   : > { %v1038_v16 = vmax.f32 %v978_v63, 0.0 }
 0x2cc   : > { %v1054_v17 = vpack.c.bf16 %v1040_v14, %v1039_v13 }
 0x2cd   : > { %v1053_v18 = vpack.c.bf16 %v1038_v16, %v1037_v15  ;;  %v1586_v20 = vpop.f32.mrb[4].mxu1 }
 0x2ce   : > { %v999_v22 = vadd.f32 %v1586_v20, %v891_v5  ;;  %v990_v23 = vpop.f32.mrb[5].mxu1 }
 0x2cf   : > { %v991_v24 = vadd.f32 %v990_v23, %v891_v5  ;;  %v1587_v25 = vpop.f32.mrb[6].mxu1  ;;  %1612 = vmatprep.mubr.bf16.mxu0 %v1053_v18 }
 0x2d0   : > { %v1002_v26 = vadd.f32 %v1587_v25, %v891_v5  ;;  %v993_v27 = vpop.f32.mrb[7].mxu1  ;;  %1613 = vmatmul.mubr.bf16.vlgmr.msra.gmra.mrb[16].mxu0 %v1054_v17  ;;  %v1043_v19 = vmax.f32 %v999_v22, 0.0 }
 0x2d1   : > { %v994_v28 = vadd.f32 %v993_v27, %v891_v5  ;;  %v1041_v12 = vmax.f32 %v991_v24, 0.0 }
 0x2d2   : > { %v1044_v11 = vmax.f32 %v1002_v26, 0.0 }
 0x2d3   : > { %v1042_v21 = vmax.f32 %v994_v28, 0.0 }
 0x2d4   : > { %v1056_v29 = vpack.c.bf16 %v1044_v11, %v1043_v19 }
 0x2d5   : > { %v1055_v30 = vpack.c.bf16 %v1042_v21, %v1041_v12  ;;  %v1590_v31 = vpop.f32.mrb[8].mxu1 }
 0x2d6   : > { %v1015_v32 = vadd.f32 %v1590_v31, %v891_v5  ;;  %v1006_v33 = vpop.f32.mrb[9].mxu1 }
 0x2d7   : > { %v1007_v34 = vadd.f32 %v1006_v33, %v891_v5  ;;  %v1591_v35 = vpop.f32.mrb[10].mxu1  ;;  %1616 = vmatprep.mubr.bf16.mxu0 %v1055_v30 }
 0x2d8   : > { %v1018_v36 = vadd.f32 %v1591_v35, %v891_v5  ;;  %v1009_v37 = vpop.f32.mrb[11].mxu1  ;;  %1617 = vmatmul.mubr.bf16.gmra.mrb[20].mxu0 %v1056_v29  ;;  %v1047_v41 = vmax.f32 %v1015_v32, 0.0 }
 0x2d9   : > { %v1010_v39 = vadd.f32 %v1009_v37, %v891_v5  ;;  %v1045_v43 = vmax.f32 %v1007_v34, 0.0 }
 0x2da   : > { %v1048_v42 = vmax.f32 %v1018_v36, 0.0 }
 0x2db   : > { %v1046_v44 = vmax.f32 %v1010_v39, 0.0 }
 0x2dc   : > { %v1058_v45 = vpack.c.bf16 %v1048_v42, %v1047_v41 }
 0x2dd   : > { %v1057_v47 = vpack.c.bf16 %v1046_v44, %v1045_v43  ;;  %v1594_v38 = vpop.f32.mrb[12].mxu1 }
 0x2de   : > { %v1031_v40 = vadd.f32 %v1594_v38, %v891_v5  ;;  %v1022_v49 = vpop.f32.mrb[13].mxu1 }
 0x2df   : > { %v1023_v50 = vadd.f32 %v1022_v49, %v891_v5  ;;  %v1595_v51 = vpop.f32.mrb[14].mxu1  ;;  %1620 = vmatprep.mubr.bf16.mxu1 %v1057_v47 }
 0x2e0   : > { %v1034_v52 = vadd.f32 %v1595_v51, %v891_v5  ;;  %v1025_v53 = vpop.f32.mrb[15].mxu1  ;;  %1621 = vmatmul.mubr.bf16.vlgmr.msra.gmra.mrb[16].mxu1 %v1058_v45  ;;  %v1051_v55 = vmax.f32 %v1031_v40, 0.0 }
 0x2e1   : > { %v1026_v54 = vadd.f32 %v1025_v53, %v891_v5  ;;  %v1049_v48 = vmax.f32 %v1023_v50, 0.0 }
 0x2e2   : > { %v1052_v46 = vmax.f32 %v1034_v52, 0.0 }
 0x2e3   : > { %v1050_v56 = vmax.f32 %v1026_v54, 0.0 }
 0x2e4   : > { %v1060_v57 = vpack.c.bf16 %v1052_v46, %v1051_v55 }
 0x2e5   : > { %v1059_v58 = vpack.c.bf16 %v1050_v56, %v1049_v48 }
 0x2e7   : > { %1624 = vmatprep.mubr.bf16.mxu1 %v1059_v58 }
 0x2e8   : > { %1625 = vmatmul.mubr.bf16.gmra.mrb[20].mxu1 %v1060_v57 }
 0x3a3   : > { %v1614_v1 = vpop.f32.mrb[16].mxu0 }
 0x3a4   : > { %v1172_v3 = vadd.f32 %v1614_v1, %v1080_v60  ;;  %v1163_v61 = vpop.f32.mrb[17].mxu0 }
 0x3a5   : > { %v1164_v6 = vadd.f32 %v1163_v61, %v1080_v60  ;;  %v1615_v7 = vpop.f32.mrb[18].mxu0 }
 0x3a6   : > { %1228 = vst [vmem:[%s2254_s26 + $0x10] sm:$0xff] %v1172_v3  ;;  %v1175_v5 = vadd.f32 %v1615_v7, %v1080_v60  ;;  %v1166_v2 = vpop.f32.mrb[19].mxu0 }
 0x3a7   : > { %1226 = vst [vmem:[%s2254_s26] sm:$0xff] %v1164_v6  ;;  %v1167_v4 = vadd.f32 %v1166_v2, %v1080_v60 }
 0x3a8   : > { %1229 = vst [vmem:[%s2254_s26 + $0x18] sm:$0xff] %v1175_v5 }
 0x3a9   : > { %1227 = vst [vmem:[%s2254_s26 + $0x8] sm:$0xff] %v1167_v4 }
 0x3ab   : > { %v1618_v8 = vpop.f32.mrb[20].mxu0 }
 0x3ac   : > { %v1188_v0 = vadd.f32 %v1618_v8, %v1080_v60  ;;  %v1179_v9 = vpop.f32.mrb[21].mxu0 }
 0x3ad   : > { %v1180_v10 = vadd.f32 %v1179_v9, %v1080_v60  ;;  %v1619_v62 = vpop.f32.mrb[22].mxu0 }
 0x3ae   : > { %1232 = vst [vmem:[%s2254_s26 + $0x30] sm:$0xff] %v1188_v0  ;;  %v1191_v63 = vadd.f32 %v1619_v62, %v1080_v60  ;;  %v1182_v13 = vpop.f32.mrb[23].mxu0 }
 0x3af   : > { %1230 = vst [vmem:[%s2254_s26 + $0x20] sm:$0xff] %v1180_v10  ;;  %v1183_v14 = vadd.f32 %v1182_v13, %v1080_v60 }
 0x3b0   : > { %1233 = vst [vmem:[%s2254_s26 + $0x38] sm:$0xff] %v1191_v63 }
 0x3b1   : > { %1231 = vst [vmem:[%s2254_s26 + $0x28] sm:$0xff] %v1183_v14 }
 0x3b3   : > { %v1622_v15 = vpop.f32.mrb[16].mxu1 }
 0x3b4   : > { %v1204_v16 = vadd.f32 %v1622_v15, %v1080_v60  ;;  %v1195_v17 = vpop.f32.mrb[17].mxu1 }
 0x3b5   : > { %v1196_v18 = vadd.f32 %v1195_v17, %v1080_v60  ;;  %v1623_v20 = vpop.f32.mrb[18].mxu1 }
 0x3b6   : > { %1236 = vst [vmem:[%s2254_s26 + $0x50] sm:$0xff] %v1204_v16  ;;  %v1207_v22 = vadd.f32 %v1623_v20, %v1080_v60  ;;  %v1198_v23 = vpop.f32.mrb[19].mxu1 }
 0x3b7   : > { %1234 = vst [vmem:[%s2254_s26 + $0x40] sm:$0xff] %v1196_v18  ;;  %v1199_v24 = vadd.f32 %v1198_v23, %v1080_v60 }
 0x3b8   : > { %1237 = vst [vmem:[%s2254_s26 + $0x58] sm:$0xff] %v1207_v22 }
 0x3b9   : > { %1235 = vst [vmem:[%s2254_s26 + $0x48] sm:$0xff] %v1199_v24 }
 0x3bb   : > { %v1626_v25 = vpop.f32.mrb[20].mxu1 }
 0x3bc   : > { %v1220_v26 = vadd.f32 %v1626_v25, %v1080_v60  ;;  %v1211_v27 = vpop.f32.mrb[21].mxu1 }
 0x3bd   : > { %v1212_v28 = vadd.f32 %v1211_v27, %v1080_v60  ;;  %v1627_v19 = vpop.f32.mrb[22].mxu1 }
 0x3be   : > { %1240 = vst [vmem:[%s2254_s26 + $0x70] sm:$0xff] %v1220_v26  ;;  %v1223_v11 = vadd.f32 %v1627_v19, %v1080_v60  ;;  %v1214_v12 = vpop.f32.mrb[23].mxu1 }
 0x3bf   : > { %1238 = vst [vmem:[%s2254_s26 + $0x60] sm:$0xff] %v1212_v28  ;;  %v1215_v21 = vadd.f32 %v1214_v12, %v1080_v60 }
 0x3c0   : > { %1241 = vst [vmem:[%s2254_s26 + $0x78] sm:$0xff] %v1223_v11 }
 0x3c1   : > { %1239 = vst [vmem:[%s2254_s26 + $0x68] sm:$0xff] %v1215_v21 }
 0x3c2   : > { %1813 = shalt.err (!%p1810_p13)
}
 0x3c3   : > { %s1814_s3 = scalar_lea.hbm %s2274_s22, 2048  ;;  %s1818_s30 = scalar_lea.hbm %s2327_s4, 4096 }
 0x3c4   : > { %p1815_p11 = scmp.ne.s32.totalorder %s2274_s22, %s1814_s3  ;;  %p1819_p3 = scmp.lt.u32.totalorder %s2274_s22, %s2327_s4 }
 0x3c5   : > { %p1820_p7 = scmp.lt.u32.totalorder %s1818_s30, %s1814_s3  ;;  %p1822_p10 = scmp.lt.u32.totalorder %s1814_s3, %s2274_s22 }
 0x3c6   : > { %p1816_p2 = pnand %p1815_p11, %p2348_p9 }
 0x3c7   : > { %p1821_p8 = por %p1820_p7, %p1819_p3 }
 0x3c8   : > { %p1817_p4 = pneg %p1816_p2 }
 0x3c9   : > { %p1823_p1 = por %p1822_p10, %p1821_p8 }
 0x3cb   : > { %p1824_p5 = pnand %p1823_p1, %p1817_p4 }
 0x3cd   : > { %1827 = shalt.err (!%p1824_p5)
}
 0x3ce   : > { %s1890_s8 = smov 128   ;;  %s1891_s6 = smov 8  }
 0x3cf   : > { %1659 = dma.vmem_to_hbm [thread:$0]  (%p2348_p9), %s2276_s11, 2048, %s2274_s22, %s1243_s19, %s1890_s8, %s1890_s8, %s1891_s6  }
 0x3d0 PF: > { %s1271_s26 = sand.u32 1, %s1862_s15   ;;  %p2349_p6 = scmp.ne.s32.totalorder %s2338_s28, 0 }
 0x3d1   : > { %s1272_s10 = scalar_lea.sflag [#allocation4], %s1271_s26 }
 0x3d2   : > { %p1666_p12 = pnand %p1373_p0, %p2349_p6 }
 0x3d4   : > { %1857 = dma.done.wait (!%p1666_p12), %s1272_s10, 2048  }
 0x3d5   : > { %1859 = vsyncadd (!%p1666_p12), %s1272_s10, 4294965248  ;;  %p20_p13 = scmp.ge.s32.totalorder %s1942_s21, 4   ;;  %s2350_s15 = smov %s1866_s16 }
 0x3d6   : > { %s2351_s16 = smov %s1870_s17  ;;  %s2352_s17 = smov %s1954_s24 }
 0x3d7   : > { %s2353_s18 = smov %s1942_s21  ;;  %22 = sbr.rel (!%p20_p13) target bundleno = 10 (0xa), region = 109 }
 0x3de   :  { %1277 = vsyncpa [#allocation3], 1 }
 0x3df   :  { %1279 = vsyncpa [#allocation3 + $0x1], 1 }
 0x3e0   :  { %1280 = vsyncpa [#allocation6], 1 }
 0x3e1   :  { %1282 = vsyncpa [#allocation6 + $0x1], 1 }
 0x3e2   :  { %1283 = vsyncpa [#allocation4], 1 }
 0x3e3   :  { %1285 = vsyncpa [#allocation4 + $0x1], 1 }

</bundles_post_ra>
